<compile_context>
chip_gen: v6e
topology: v6e:2x2x1
jax: 0.10.0
libtpu: 0.0.40
codegen_flags: <defaults>
</compile_context>

<pallas_src>
import functools

import jax
import jax.numpy as jnp
from jax.experimental import pallas as pl
from jax.experimental.pallas import tpu as pltpu

LANE = 128
ROW_ALIGN = 16  # bf16 packs 16 rows per sublane tile -> keep row tiles x16


def _cdiv(a, b):
    return (a + b - 1) // b


def _round_up(x, m):
    return _cdiv(x, m) * m


def _feature_pad_multiple(dim):
    """128 for small dims / 128x128-MXU chips, 256 on v6e/v7x for dims >= 256."""
    if dim < 256:
        return LANE
    try:
        kind = jax.devices()[0].device_kind.lower()
    except Exception:
        return LANE
    if any(t in kind for t in ("v2", "v3", "v4", "v5")):
        return LANE
    return 256


def _vmem_cap_bytes():
    """~75% of physical VMEM (=> ~48 MiB on v7x, ~96 MiB on v5e/v6e)."""
    try:
        phys = int(pltpu.get_tpu_info().vmem_capacity_bytes)
    except Exception:
        phys = 64 << 20  # conservative (v7x-sized) default
    return (phys // 4) * 3


def _mlp_fused_kernel(x_ref, *refs, num_layers):
    """refs = (w0, b0, w1, b1, ..., w_{L-1}, b_{L-1}, o_ref).

    x_ref: (TM, Kp0) bf16 row tile.   w_i: (Kp_i, Np_i) bf16, VMEM-resident.
    b_i: (1, Np_i) f32.               o_ref: (TM, Np_last) out dtype.
    """
    o_ref = refs[-1]
    h = x_ref[...]  # bf16 carry
    for i in range(num_layers):
        w = refs[2 * i][...]
        b = refs[2 * i + 1][...]
        # bf16 MXU matmul, f32 accumulation; bias add / ReLU in f32 on the VPU.
        acc = jnp.dot(h, w, preferred_element_type=jnp.float32)
        acc = acc + b  # (1, Np) broadcasts over rows
        if i < num_layers - 1:
            h = jnp.maximum(acc, 0.0).astype(jnp.bfloat16)  # bf16 carry
        else:
            o_ref[...] = acc.astype(o_ref.dtype)


def init_mlp_params(key, input_dim, hidden_dim, output_dim, num_layers):
    """nn.Linear-style init; weights stored transposed as (in, out), f32."""
    h = [hidden_dim] * (num_layers - 1)
    params = []
    for n, k in zip([input_dim] + h, h + [output_dim]):
        key, kw, kb = jax.random.split(key, 3)
        bound = 1.0 / jnp.sqrt(n)
        w = jax.random.uniform(kw, (n, k), jnp.float32, -bound, bound)
        b = jax.random.uniform(kb, (k,), jnp.float32, -bound, bound)
        params.append((w, b))
    return params


def pad_params_for_tpu(params):
    """Zero-pad features to MXU-friendly multiples; weights cast to bf16 once."""
    padded = []
    for w, b in params:
        n, k = w.shape
        n_p = _round_up(n, _feature_pad_multiple(n))
        k_p = _round_up(k, _feature_pad_multiple(k))
        wp = jnp.zeros((n_p, k_p), jnp.bfloat16).at[:n, :k].set(w.astype(jnp.bfloat16))
        bp = jnp.zeros((1, k_p), jnp.float32).at[0, :k].set(b)
        padded.append((wp, bp))
    return padded


def _row_tiling(m, tm):
    """Even row split: bounded padding, >= 2 grid steps when rows permit."""
    m_al = _round_up(max(m, ROW_ALIGN), ROW_ALIGN)
    n_tiles = max(_cdiv(m_al, tm), 1)
    if m_al >= 2 * ROW_ALIGN:
        n_tiles = max(n_tiles, 2)  # let the 'parallel' axis use both v7x TCs
    tm_eff = _round_up(_cdiv(m_al, n_tiles), ROW_ALIGN)
    return tm_eff, tm_eff * n_tiles, n_tiles


def _vmem_budget_bytes(tm_eff, kp0, np_last, out_itemsize, padded_params):
    # Conservative: charge weights double-buffered even though we request
    # Buffered(1), so a fallback to default buffering still fits.
    budget = 2 * tm_eff * kp0 * 2                  # bf16 x tile, double-buffered
    budget += 2 * tm_eff * np_last * out_itemsize  # out tile, double-buffered
    widest = kp0
    for w, b in padded_params:
        budget += 2 * int(w.size) * 2
        budget += 2 * 8 * int(b.shape[1]) * 4      # (1,N) tiles sublane-pad to 8
        widest = max(widest, int(w.shape[1]))
    budget += 2 * tm_eff * widest * (4 + 2)        # live f32 acc + bf16 carry, 2x headroom
    return budget


def mlp_forward_pallas(x, padded_params, output_dim, *, tm=1024, out_dtype=jnp.float32):
    """x: (..., input_dim) -> (..., output_dim), fused MLP forward on TPU."""
    lead = x.shape[:-1]
    in_dim = x.shape[-1]
    m = 1
    for d in lead:
        m *= d
    num_layers = len(padded_params)
    kp0 = padded_params[0][0].shape[0]
    np_last = padded_params[-1][0].shape[1]
    out_itemsize = jnp.dtype(out_dtype).itemsize

    vmem_cap = _vmem_cap_bytes()

    # Largest row tile whose working set fits this generation's VMEM cap.
    cand = max(tm, ROW_ALIGN)
    while True:
        tm_eff, mp, n_tiles = _row_tiling(m, cand)
        budget = _vmem_budget_bytes(tm_eff, kp0, np_last, out_itemsize, padded_params)
        if budget <= vmem_cap or cand <= ROW_ALIGN:
            break
        cand //= 2

    x2 = x.reshape(m, in_dim).astype(jnp.bfloat16)

    if budget > vmem_cap:
        # Resident weights do not fit VMEM (e.g. very wide layers on v7x's
        # 64 MiB).  Fall back to plain XLA with identical numerics.
        # TODO(synk): stream oversized layer weights from HBM with
        # pltpu.emit_pipeline over an extra K/N grid axis instead.
        h = jnp.zeros((m, kp0), jnp.bfloat16).at[:, :in_dim].set(x2)
        for i, (w, b) in enumerate(padded_params):
            acc = jnp.dot(h, w, preferred_element_type=jnp.float32) + b
            if i < num_layers - 1:
                h = jnp.maximum(acc, 0.0).astype(jnp.bfloat16)
            else:
                h = acc
        return h[:, :output_dim].astype(out_dtype).reshape(*lead, output_dim)

    xp = jnp.zeros((mp, kp0), jnp.bfloat16).at[:m, :in_dim].set(x2)

    flat_inputs = [xp]
    for w, b in padded_params:
        flat_inputs.append(w)
        flat_inputs.append(b)

    flops = 2 * mp * sum(int(w.shape[0]) * int(w.shape[1]) for w, _ in padded_params)
    bytes_accessed = (
        int(xp.size) * 2
        + mp * np_last * out_itemsize
        + sum(int(w.size) * 2 + int(b.size) * 4 for w, b in padded_params)
    )
    cost = pl.CostEstimate(flops=flops, transcendentals=0, bytes_accessed=bytes_accessed)

    vmem_limit = int(min(max(2 * budget, 32 << 20), vmem_cap))

    def build_and_run(single_buffer_weights):
        w_kwargs = (
            {"pipeline_mode": pl.Buffered(1)} if single_buffer_weights else {}
        )
        in_specs = [pl.BlockSpec((tm_eff, kp0), lambda i: (i, 0))]
        for w, b in padded_params:
            kp_i, np_i = w.shape
            # Constant index_maps -> weights/biases stay resident in VMEM.
            in_specs.append(pl.BlockSpec((kp_i, np_i), lambda i: (0, 0), **w_kwargs))
            in_specs.append(pl.BlockSpec((1, np_i), lambda i: (0, 0), **w_kwargs))
        return pl.pallas_call(
            functools.partial(_mlp_fused_kernel, num_layers=num_layers),
            out_shape=jax.ShapeDtypeStruct((mp, np_last), out_dtype),
            grid=(n_tiles,),
            in_specs=in_specs,
            out_specs=pl.BlockSpec((tm_eff, np_last), lambda i: (i, 0)),
            compiler_params=pltpu.CompilerParams(
                dimension_semantics=("parallel",),
                vmem_limit_bytes=vmem_limit,
            ),
            cost_estimate=cost,
        )(*flat_inputs)

    try:
        # Ask for single-buffered resident weights (halves their VMEM charge).
        out = build_and_run(True)
    except Exception:
        # pipeline_mode=pl.Buffered(1) unsupported on this JAX/Mosaic version.
        out = build_and_run(False)

    return out[:m, :output_dim].reshape(*lead, output_dim)


def mlp_reference(x, params):
    """Pure-JAX f32 reference matching the PyTorch MLP.forward."""
    h = x
    for i, (w, b) in enumerate(params):
        h = h @ w + b
        if i < len(params) - 1:
            h = jnp.maximum(h, 0.0)
    return h


if __name__ == "__main__":
    key = jax.random.PRNGKey(0)
    # NOTE: tiny dims (32/32/16) are for correctness validation only; padding
    # 32 -> 128 wastes MXU FLOPs, so real deployments should use wider layers
    # (or route such shapes through plain XLA).
    input_dim, hidden_dim, output_dim, num_layers = 32, 32, 16, 3
    batch, seq = 4, 16  # m=64 rows -> exercises the 2-step parallel grid

    key, kx, kp = jax.random.split(key, 3)
    x = jax.random.normal(kx, (batch, seq, input_dim), dtype=jnp.float32)
    params = init_mlp_params(kp, input_dim, hidden_dim, output_dim, num_layers)
    padded_params = pad_params_for_tpu(params)

    out = mlp_forward_pallas(x, padded_params, output_dim)
    out = jax.block_until_ready(out)

    ref = mlp_reference(x, params)
    assert out.shape == (batch, seq, output_dim), out.shape
    # bf16 matmul operands (f32 accumulation) -> small, bounded deviation from
    # the pure-f32 reference.
    assert jnp.allclose(out, ref, atol=5e-2, rtol=5e-2), (
        "mismatch vs reference: max abs diff = "
        f"{float(jnp.max(jnp.abs(out - ref)))}"
    )

    print("KERNEL_OK")
</pallas_src>

<mosaic_0001>
module attributes {stable_mosaic.version = 11 : i64} {
  func.func @_mlp_fused_kernel(%arg0: i32, %arg1: memref<32x128xbf16, #tpu.memory_space<vmem>>, %arg2: memref<128x128xbf16, #tpu.memory_space<vmem>>, %arg3: memref<1x128xf32, #tpu.memory_space<vmem>>, %arg4: memref<128x128xbf16, #tpu.memory_space<vmem>>, %arg5: memref<1x128xf32, #tpu.memory_space<vmem>>, %arg6: memref<128x128xbf16, #tpu.memory_space<vmem>>, %arg7: memref<1x128xf32, #tpu.memory_space<vmem>>, %arg8: memref<32x128xf32, #tpu.memory_space<vmem>>) attributes {dimension_semantics = [#tpu.dimension_semantics<parallel>], iteration_bounds = array<i64: 2>, scalar_prefetch = 0 : i64, scratch_operands = 0 : i64, tpu.core_type = #tpu.core_type<tc>, window_params = [{transform_indices = @transform_0, window_bounds = array<i64: 32, 128>}, {pipeline_mode = #tpu.pipeline_mode<synchronous>, transform_indices = @transform_1, window_bounds = array<i64: 128, 128>}, {pipeline_mode = #tpu.pipeline_mode<synchronous>, transform_indices = @transform_2, window_bounds = array<i64: 1, 128>}, {pipeline_mode = #tpu.pipeline_mode<synchronous>, transform_indices = @transform_3, window_bounds = array<i64: 128, 128>}, {pipeline_mode = #tpu.pipeline_mode<synchronous>, transform_indices = @transform_4, window_bounds = array<i64: 1, 128>}, {pipeline_mode = #tpu.pipeline_mode<synchronous>, transform_indices = @transform_5, window_bounds = array<i64: 128, 128>}, {pipeline_mode = #tpu.pipeline_mode<synchronous>, transform_indices = @transform_6, window_bounds = array<i64: 1, 128>}, {transform_indices = @transform_7, window_bounds = array<i64: 32, 128>}]} {
    %c0 = arith.constant 0 : index
    %c0_0 = arith.constant 0 : index
    %0 = vector.load %arg1[%c0, %c0_0] : memref<32x128xbf16, #tpu.memory_space<vmem>>, vector<32x128xbf16>
    %c0_1 = arith.constant 0 : index
    %c0_2 = arith.constant 0 : index
    %1 = vector.load %arg2[%c0_1, %c0_2] : memref<128x128xbf16, #tpu.memory_space<vmem>>, vector<128x128xbf16>
    %c0_3 = arith.constant 0 : index
    %c0_4 = arith.constant 0 : index
    %2 = vector.load %arg3[%c0_3, %c0_4] : memref<1x128xf32, #tpu.memory_space<vmem>>, vector<1x128xf32>
    %cst = arith.constant dense<0.000000e+00> : vector<32x128xf32>
    %3 = tpu.matmul %0, %1, %cst {dimension_numbers = #tpu.dot_dimension_numbers<[1], [0], [0], [1], [0, 0, 1, 1], [], []>} : vector<32x128xbf16>, vector<128x128xbf16>, vector<32x128xf32> -> vector<32x128xf32>
    %4 = vector.broadcast %2 : vector<1x128xf32> to vector<32x128xf32>
    %5 = arith.addf %3, %4 : vector<32x128xf32>
    %cst_5 = arith.constant 0.000000e+00 : f32
    %6 = vector.broadcast %cst_5 : f32 to vector<32x128xf32>
    %7 = arith.maximumf %5, %6 : vector<32x128xf32>
    %8 = arith.truncf %7 : vector<32x128xf32> to vector<32x128xbf16>
    %c0_6 = arith.constant 0 : index
    %c0_7 = arith.constant 0 : index
    %9 = vector.load %arg4[%c0_6, %c0_7] : memref<128x128xbf16, #tpu.memory_space<vmem>>, vector<128x128xbf16>
    %c0_8 = arith.constant 0 : index
    %c0_9 = arith.constant 0 : index
    %10 = vector.load %arg5[%c0_8, %c0_9] : memref<1x128xf32, #tpu.memory_space<vmem>>, vector<1x128xf32>
    %cst_10 = arith.constant dense<0.000000e+00> : vector<32x128xf32>
    %11 = tpu.matmul %8, %9, %cst_10 {dimension_numbers = #tpu.dot_dimension_numbers<[1], [0], [0], [1], [0, 0, 1, 1], [], []>} : vector<32x128xbf16>, vector<128x128xbf16>, vector<32x128xf32> -> vector<32x128xf32>
    %12 = vector.broadcast %10 : vector<1x128xf32> to vector<32x128xf32>
    %13 = arith.addf %11, %12 : vector<32x128xf32>
    %cst_11 = arith.constant 0.000000e+00 : f32
    %14 = vector.broadcast %cst_11 : f32 to vector<32x128xf32>
    %15 = arith.maximumf %13, %14 : vector<32x128xf32>
    %16 = arith.truncf %15 : vector<32x128xf32> to vector<32x128xbf16>
    %c0_12 = arith.constant 0 : index
    %c0_13 = arith.constant 0 : index
    %17 = vector.load %arg6[%c0_12, %c0_13] : memref<128x128xbf16, #tpu.memory_space<vmem>>, vector<128x128xbf16>
    %c0_14 = arith.constant 0 : index
    %c0_15 = arith.constant 0 : index
    %18 = vector.load %arg7[%c0_14, %c0_15] : memref<1x128xf32, #tpu.memory_space<vmem>>, vector<1x128xf32>
    %cst_16 = arith.constant dense<0.000000e+00> : vector<32x128xf32>
    %19 = tpu.matmul %16, %17, %cst_16 {dimension_numbers = #tpu.dot_dimension_numbers<[1], [0], [0], [1], [0, 0, 1, 1], [], []>} : vector<32x128xbf16>, vector<128x128xbf16>, vector<32x128xf32> -> vector<32x128xf32>
    %20 = vector.broadcast %18 : vector<1x128xf32> to vector<32x128xf32>
    %21 = arith.addf %19, %20 : vector<32x128xf32>
    %c0_17 = arith.constant 0 : index
    %c0_18 = arith.constant 0 : index
    %22 = vector.load %arg8[%c0_17, %c0_18] : memref<32x128xf32, #tpu.memory_space<vmem>>, vector<32x128xf32>
    tpu.vector_store %arg8[%c0_17, %c0_18], %21 {strides = array<i32>} : memref<32x128xf32, #tpu.memory_space<vmem>>, vector<32x128xf32>,
    return
  }
  func.func @transform_0(%arg0: i32) -> (i32, i32) {
    %c0_i32 = arith.constant 0 : i32
    %c0_i32_0 = arith.constant 0 : i32
    return %arg0, %c0_i32 : i32, i32
  }
  func.func @transform_1(%arg0: i32) -> (i32, i32) {
    %c0_i32 = arith.constant 0 : i32
    %c0_i32_0 = arith.constant 0 : i32
    %c0_i32_1 = arith.constant 0 : i32
    return %c0_i32, %c0_i32_0 : i32, i32
  }
  func.func @transform_2(%arg0: i32) -> (i32, i32) {
    %c0_i32 = arith.constant 0 : i32
    %c0_i32_0 = arith.constant 0 : i32
    %c0_i32_1 = arith.constant 0 : i32
    return %c0_i32, %c0_i32_0 : i32, i32
  }
  func.func @transform_3(%arg0: i32) -> (i32, i32) {
    %c0_i32 = arith.constant 0 : i32
    %c0_i32_0 = arith.constant 0 : i32
    %c0_i32_1 = arith.constant 0 : i32
    return %c0_i32, %c0_i32_0 : i32, i32
  }
  func.func @transform_4(%arg0: i32) -> (i32, i32) {
    %c0_i32 = arith.constant 0 : i32
    %c0_i32_0 = arith.constant 0 : i32
    %c0_i32_1 = arith.constant 0 : i32
    return %c0_i32, %c0_i32_0 : i32, i32
  }
  func.func @transform_5(%arg0: i32) -> (i32, i32) {
    %c0_i32 = arith.constant 0 : i32
    %c0_i32_0 = arith.constant 0 : i32
    %c0_i32_1 = arith.constant 0 : i32
    return %c0_i32, %c0_i32_0 : i32, i32
  }
  func.func @transform_6(%arg0: i32) -> (i32, i32) {
    %c0_i32 = arith.constant 0 : i32
    %c0_i32_0 = arith.constant 0 : i32
    %c0_i32_1 = arith.constant 0 : i32
    return %c0_i32, %c0_i32_0 : i32, i32
  }
  func.func @transform_7(%arg0: i32) -> (i32, i32) {
    %c0_i32 = arith.constant 0 : i32
    %c0_i32_0 = arith.constant 0 : i32
    return %arg0, %c0_i32 : i32, i32
  }
}

module attributes {stable_mosaic.version = 11 : i64} {
  func.func @_mlp_fused_kernel(%arg0: i32, %arg1: memref<32x128xbf16, #tpu.memory_space<vmem>>, %arg2: memref<128x128xbf16, #tpu.memory_space<vmem>>, %arg3: memref<1x128xf32, #tpu.memory_space<vmem>>, %arg4: memref<128x128xbf16, #tpu.memory_space<vmem>>, %arg5: memref<1x128xf32, #tpu.memory_space<vmem>>, %arg6: memref<128x128xbf16, #tpu.memory_space<vmem>>, %arg7: memref<1x128xf32, #tpu.memory_space<vmem>>, %arg8: memref<32x128xf32, #tpu.memory_space<vmem>>) attributes {dimension_semantics = [#tpu.dimension_semantics<parallel>], iteration_bounds = array<i64: 2>, scalar_prefetch = 0 : i64, scratch_operands = 0 : i64, tpu.core_type = #tpu.core_type<tc>, window_params = [{transform_indices = @transform_0, window_bounds = array<i64: 32, 128>}, {pipeline_mode = #tpu.pipeline_mode<synchronous>, transform_indices = @transform_1, window_bounds = array<i64: 128, 128>}, {pipeline_mode = #tpu.pipeline_mode<synchronous>, transform_indices = @transform_2, window_bounds = array<i64: 1, 128>}, {pipeline_mode = #tpu.pipeline_mode<synchronous>, transform_indices = @transform_3, window_bounds = array<i64: 128, 128>}, {pipeline_mode = #tpu.pipeline_mode<synchronous>, transform_indices = @transform_4, window_bounds = array<i64: 1, 128>}, {pipeline_mode = #tpu.pipeline_mode<synchronous>, transform_indices = @transform_5, window_bounds = array<i64: 128, 128>}, {pipeline_mode = #tpu.pipeline_mode<synchronous>, transform_indices = @transform_6, window_bounds = array<i64: 1, 128>}, {transform_indices = @transform_7, window_bounds = array<i64: 32, 128>}]} {
    %c0 = arith.constant 0 : index
    %c0_0 = arith.constant 0 : index
    %0 = vector.load %arg1[%c0, %c0_0] : memref<32x128xbf16, #tpu.memory_space<vmem>>, vector<32x128xbf16>
    %c0_1 = arith.constant 0 : index
    %c0_2 = arith.constant 0 : index
    %1 = vector.load %arg2[%c0_1, %c0_2] : memref<128x128xbf16, #tpu.memory_space<vmem>>, vector<128x128xbf16>
    %c0_3 = arith.constant 0 : index
    %c0_4 = arith.constant 0 : index
    %2 = vector.load %arg3[%c0_3, %c0_4] : memref<1x128xf32, #tpu.memory_space<vmem>>, vector<1x128xf32>
    %cst = arith.constant dense<0.000000e+00> : vector<32x128xf32>
    %3 = tpu.matmul %0, %1, %cst {dimension_numbers = #tpu.dot_dimension_numbers<[1], [0], [0], [1], [0, 0, 1, 1], [], []>} : vector<32x128xbf16>, vector<128x128xbf16>, vector<32x128xf32> -> vector<32x128xf32>
    %4 = vector.broadcast %2 : vector<1x128xf32> to vector<32x128xf32>
    %5 = arith.addf %3, %4 : vector<32x128xf32>
    %cst_5 = arith.constant 0.000000e+00 : f32
    %6 = vector.broadcast %cst_5 : f32 to vector<32x128xf32>
    %7 = arith.maximumf %5, %6 : vector<32x128xf32>
    %8 = arith.truncf %7 : vector<32x128xf32> to vector<32x128xbf16>
    %c0_6 = arith.constant 0 : index
    %c0_7 = arith.constant 0 : index
    %9 = vector.load %arg4[%c0_6, %c0_7] : memref<128x128xbf16, #tpu.memory_space<vmem>>, vector<128x128xbf16>
    %c0_8 = arith.constant 0 : index
    %c0_9 = arith.constant 0 : index
    %10 = vector.load %arg5[%c0_8, %c0_9] : memref<1x128xf32, #tpu.memory_space<vmem>>, vector<1x128xf32>
    %cst_10 = arith.constant dense<0.000000e+00> : vector<32x128xf32>
    %11 = tpu.matmul %8, %9, %cst_10 {dimension_numbers = #tpu.dot_dimension_numbers<[1], [0], [0], [1], [0, 0, 1, 1], [], []>} : vector<32x128xbf16>, vector<128x128xbf16>, vector<32x128xf32> -> vector<32x128xf32>
    %12 = vector.broadcast %10 : vector<1x128xf32> to vector<32x128xf32>
    %13 = arith.addf %11, %12 : vector<32x128xf32>
    %cst_11 = arith.constant 0.000000e+00 : f32
    %14 = vector.broadcast %cst_11 : f32 to vector<32x128xf32>
    %15 = arith.maximumf %13, %14 : vector<32x128xf32>
    %16 = arith.truncf %15 : vector<32x128xf32> to vector<32x128xbf16>
    %c0_12 = arith.constant 0 : index
    %c0_13 = arith.constant 0 : index
    %17 = vector.load %arg6[%c0_12, %c0_13] : memref<128x128xbf16, #tpu.memory_space<vmem>>, vector<128x128xbf16>
    %c0_14 = arith.constant 0 : index
    %c0_15 = arith.constant 0 : index
    %18 = vector.load %arg7[%c0_14, %c0_15] : memref<1x128xf32, #tpu.memory_space<vmem>>, vector<1x128xf32>
    %cst_16 = arith.constant dense<0.000000e+00> : vector<32x128xf32>
    %19 = tpu.matmul %16, %17, %cst_16 {dimension_numbers = #tpu.dot_dimension_numbers<[1], [0], [0], [1], [0, 0, 1, 1], [], []>} : vector<32x128xbf16>, vector<128x128xbf16>, vector<32x128xf32> -> vector<32x128xf32>
    %20 = vector.broadcast %18 : vector<1x128xf32> to vector<32x128xf32>
    %21 = arith.addf %19, %20 : vector<32x128xf32>
    %c0_17 = arith.constant 0 : index
    %c0_18 = arith.constant 0 : index
    %22 = vector.load %arg8[%c0_17, %c0_18] : memref<32x128xf32, #tpu.memory_space<vmem>>, vector<32x128xf32>
    tpu.vector_store %arg8[%c0_17, %c0_18], %21 {strides = array<i32>} : memref<32x128xf32, #tpu.memory_space<vmem>>, vector<32x128xf32>,
    return
  }
  func.func @transform_0(%arg0: i32) -> (i32, i32) {
    %c0_i32 = arith.constant 0 : i32
    %c0_i32_0 = arith.constant 0 : i32
    return %arg0, %c0_i32 : i32, i32
  }
  func.func @transform_1(%arg0: i32) -> (i32, i32) {
    %c0_i32 = arith.constant 0 : i32
    %c0_i32_0 = arith.constant 0 : i32
    %c0_i32_1 = arith.constant 0 : i32
    return %c0_i32, %c0_i32_0 : i32, i32
  }
  func.func @transform_2(%arg0: i32) -> (i32, i32) {
    %c0_i32 = arith.constant 0 : i32
    %c0_i32_0 = arith.constant 0 : i32
    %c0_i32_1 = arith.constant 0 : i32
    return %c0_i32, %c0_i32_0 : i32, i32
  }
  func.func @transform_3(%arg0: i32) -> (i32, i32) {
    %c0_i32 = arith.constant 0 : i32
    %c0_i32_0 = arith.constant 0 : i32
    %c0_i32_1 = arith.constant 0 : i32
    return %c0_i32, %c0_i32_0 : i32, i32
  }
  func.func @transform_4(%arg0: i32) -> (i32, i32) {
    %c0_i32 = arith.constant 0 : i32
    %c0_i32_0 = arith.constant 0 : i32
    %c0_i32_1 = arith.constant 0 : i32
    return %c0_i32, %c0_i32_0 : i32, i32
  }
  func.func @transform_5(%arg0: i32) -> (i32, i32) {
    %c0_i32 = arith.constant 0 : i32
    %c0_i32_0 = arith.constant 0 : i32
    %c0_i32_1 = arith.constant 0 : i32
    return %c0_i32, %c0_i32_0 : i32, i32
  }
  func.func @transform_6(%arg0: i32) -> (i32, i32) {
    %c0_i32 = arith.constant 0 : i32
    %c0_i32_0 = arith.constant 0 : i32
    %c0_i32_1 = arith.constant 0 : i32
    return %c0_i32, %c0_i32_0 : i32, i32
  }
  func.func @transform_7(%arg0: i32) -> (i32, i32) {
    %c0_i32 = arith.constant 0 : i32
    %c0_i32_0 = arith.constant 0 : i32
    return %arg0, %c0_i32 : i32, i32
  }
}

</mosaic_0001>

<bundles_post_ra>
// kernel: tpu_custom_call.1
= control target key start
LH: loop header
LB: loop body
LE: loop exit
PB: predicated region body
PF: predicated region fallthrough
CT: control target
= control target key end

     0   :  { %s1555_s0 = inlined_call_operand.hbm [shape: bf16[64,128], index: 0, kind: input, shape index: {}]   ;;  %s1556_s1 = inlined_call_operand.hbm [shape: bf16[128,128], index: 1, kind: input, shape index: {}]   ;;  %s1557_s2 = inlined_call_operand.vmem [shape: f32[1,128], index: 2, kind: input, shape index: {}]   ;;  %s1558_s3 = inlined_call_operand.hbm [shape: bf16[128,128], index: 3, kind: input, shape index: {}]   ;;  %s1559_s4 = inlined_call_operand.vmem [shape: f32[1,128], index: 4, kind: input, shape index: {}]   ;;  %s1560_s5 = inlined_call_operand.hbm [shape: bf16[128,128], index: 5, kind: input, shape index: {}]   ;;  %s1561_s6 = inlined_call_operand.vmem [shape: f32[1,128], index: 6, kind: input, shape index: {}]   ;;  %s1562_s7 = inlined_call_operand.hbm [shape: f32[64,128], index: 7, kind: output, shape index: {}]  }
   0x1   :  { %1569 = sst [smem:[#allocation15_spill]] %s1556_s1 }
   0x2   :  { %12 = vsyncpa [#allocation3], 0 }
   0x3   :  { %14 = vsyncpa [#allocation3 + $0x1], 0 }
   0x4   :  { %15 = vsyncpa [#allocation6], 0 }
   0x5   :  { %16 = vsyncpa [#allocation9], 0 }
   0x6   :  { %17 = vsyncpa [#allocation4], 0 }
   0x7   :  { %19 = vsyncpa [#allocation4 + $0x1], 0  ;;  %s1329_s24 = smov 0   ;;  %s1331_s25 = smov 0  }
   0x8   :  { %s1333_s26 = smov 0   ;;  %s1335_s27 = smov 0  }
   0x9 LB: > { %s1350_s28 = sadd.s32 4294967295, %s1278_s27   ;;  %s852_s29 = sadd.s32 4294967294, %s1278_s27   ;;  %s1278_s27 = sphi %s1335_s27, %s1591_s27   ;;  %s1274_s26 = sphi %s1333_s26, %s1590_s26   ;;  %s1270_s25 = sphi %s1331_s25, %s1589_s25   ;;  %s1266_s24 = sphi %s1329_s24, %s1588_s24  }
   0xa   : > { %p45_p0 = scmp.ne.s32.totalorder %s1270_s25, %s1266_s24  ;;  %p1563_p1 = scmp.eq.s32.totalorder %s1350_s28, 0 }
   0xb   : > { %p195_p2 = scmp.eq.s32.totalorder %s1350_s28, 1  ;;  %p201_p3 = scmp.eq.s32.totalorder %s852_s29, 1 }
   0xc   : > { %p1359_p4 = por %p1563_p1, %p45_p0  ;;  %p853_p5 = scmp.ge.s32.totalorder %s1278_s27, 1 }
   0xd   : > { %p1364_p6 = por %p201_p3, %p45_p0  ;;  %p208_p7 = scmp.lt.s32.totalorder %s1278_s27, 3 }
   0xe   : > { %s1570_s30 = scalar_select %p1359_p4, 1, 0 }
   0xf   : > { %s1571_s8 = scalar_select %p1364_p6, 1, 0 }
  0x10   : > { %p1369_p8 = pnand %p853_p5, %p208_p7  ;;  %s1280_s10 = smov [#allocation5]  }
  0x11   : > { %s220_s11 = sshll.u32 %s1280_s10, 4  ;;  %s1281_s13 = smov [#allocation7]   ;;  %s221_s11 = int_to_ptr.vmem [resolvable:$true] %s220_s11 }
  0x12   : > { %s1572_s9 = scalar_select %p1369_p8, 1, 0 }
  0x13   : > { %p1009_p9 = pneg %p1369_p8  ;;  %s236_s14 = sshll.u32 %s1281_s13, 4  ;;  %s237_s14 = int_to_ptr.vmem [resolvable:$true] %s236_s14 }
  0x14   : > { %s1282_s15 = smov [#allocation8]   ;;  %s1111_s17 = scalar_lea.vmem %s221_s11, 1024 }
  0x15   : > { %p1378_p11 = pnand %p1009_p9, %p1563_p1  ;;  %s252_s16 = sshll.u32 %s1282_s15, 4  ;;  %s253_s16 = int_to_ptr.vmem [resolvable:$true] %s252_s16 }
  0x16   : > { %p1112_p13 = scmp.ne.s32.totalorder %s221_s11, %s1111_s17  ;;  %p1119_p5 = scmp.lt.s32.totalorder %s221_s11, %s221_s11 }
  0x17   : > { %p1102_p12 = pneg %p1378_p11  ;;  %p1120_p7 = scmp.lt.s32.totalorder %s1111_s17, %s1111_s17 }
  0x19   : > { %p1114_p0 = pnand %p1112_p13, %p1102_p12  ;;  %p1121_p9 = por %p1120_p7, %p1119_p5 }
  0x1b   : > { %p1115_p3 = pneg %p1114_p0 }
  0x1d   : > { %p1122_p10 = pnand %p1121_p9, %p1115_p3 }
  0x1f   : > { %1125 = shalt.err (!%p1122_p10)
}
  0x20   : > { %s1564_s18 = smov 64   ;;  %s1565_s19 = smov 4  }
  0x21   : > { %s1574_s1 = sld [smem:[#allocation15_spill]]  ;;  %s1137_s22 = scalar_lea.vmem %s237_s14, 1024 }
  0x22   : > { %p1138_p13 = scmp.ne.s32.totalorder %s237_s14, %s1137_s22  ;;  %p1145_p3 = scmp.lt.s32.totalorder %s237_s14, %s237_s14 }
  0x23   : > { %p1146_p10 = scmp.lt.s32.totalorder %s1137_s22, %s1137_s22 }
  0x24   : > { %p1140_p0 = pnand %p1138_p13, %p1102_p12 }
  0x25   : > { %p1147_p7 = por %p1146_p10, %p1145_p3 }
  0x26   : > { %p1141_p5 = pneg %p1140_p0 }
  0x27   : > { %1012 = dma.hbm_to_vmem [thread:$0]  (!%p1378_p11), %s1574_s1, 1024, %s221_s11, [#allocation6], %s1564_s18, %s1564_s18, %s1565_s19  }
  0x28   : > { %p1148_p9 = pnand %p1147_p7, %p1141_p5 }
  0x2a   : > { %1151 = shalt.err (!%p1148_p9)
}
  0x2b   : > { %1015 = dma.hbm_to_vmem [thread:$0]  (!%p1378_p11), %s1558_s3, 1024, %s237_s14, [#allocation6], %s1564_s18, %s1564_s18, %s1565_s19  }
  0x2c   : > { %s1163_s10 = scalar_lea.vmem %s253_s16, 1024  ;;  %p1171_p3 = scmp.lt.s32.totalorder %s253_s16, %s253_s16 }
  0x2d   : > { %p1164_p1 = scmp.ne.s32.totalorder %s253_s16, %s1163_s10  ;;  %p1172_p5 = scmp.lt.s32.totalorder %s1163_s10, %s1163_s10 }
  0x2f   : > { %p1166_p13 = pnand %p1164_p1, %p1102_p12  ;;  %p1173_p10 = por %p1172_p5, %p1171_p3 }
  0x31   : > { %p1167_p0 = pneg %p1166_p13 }
  0x33   : > { %p1174_p7 = pnand %p1173_p10, %p1167_p0 }
  0x35   : > { %1177 = shalt.err (!%p1174_p7)
}
  0x36   : > { %1018 = dma.hbm_to_vmem [thread:$0]  (!%p1378_p11), %s1560_s5, 1024, %s253_s16, [#allocation9], %s1564_s18, %s1564_s18, %s1565_s19  }
  0x37   : > { %s1418_s14 = sadd.s32 1, %s1278_s27   ;;  %s32_s15 = sadd.s32 1, %s1274_s26 }
  0x38   : > { %s29_s12 = ssub.s32 %s1278_s27, %s1418_s14  ;;  %p39_p12 = scmp.ne.s32.totalorder %s1274_s26, %s1270_s25 }
  0x39   : > { %p30_p1 = scmp.eq.s32.totalorder %s29_s12, 0  ;;  %p40_p9 = scmp.eq.s32.totalorder %s1278_s27, 0 }
  0x3a   : > { %p1030_p13 = scmp.lt.s32.totalorder %s1278_s27, 2  ;;  %p1432_p3 = por %p195_p2, %p39_p12 }
  0x3b   : > { %s1428_s17 = scalar_select %p30_p1, %s1274_s26, %s32_s15  }
  0x3c   : > { %p41_p0 = por %p40_p9, %p39_p12  ;;  %s269_s21 = sand.u32 1, %s1274_s26  }
  0x3d   : > { %s1575_s20 = scalar_select %p1432_p3, 1, 0 }
  0x3e   : > { %s901_s22 = sshll.u32 %s1278_s27, 8  ;;  %s858_s16 = sshll.u32 %s269_s21, 4 }
  0x3f   : > { %s1441_s10 = scalar_lea.hbm %s1555_s0, %s901_s22  ;;  %s273_s11 = scalar_lea.vmem [#allocation2], %s858_s16 }
  0x40   : > { %s280_s13 = sshll.u32 %s273_s11, 4  ;;  %p1443_p11 = pnand %p1030_p13, %p41_p0  ;;  %s1447_s13 = int_to_ptr.vmem [resolvable:$true] %s280_s13 }
  0x41   : > { %s1449_s15 = scalar_lea.sflag [#allocation3], %s269_s21  ;;  %s1178_s18 = scalar_lea.hbm %s1441_s10, 256 }
  0x42   : > { %p1179_p2 = scmp.ne.s32.totalorder %s1441_s10, %s1178_s18  ;;  %p1180_p5 = pneg %p1443_p11 }
  0x43   : > { %s1183_s16 = scalar_lea.hbm %s1555_s0, 512  ;;  %p1184_p1 = scmp.lt.s32.totalorder %s1441_s10, %s1555_s0 }
  0x44   : > { %p1181_p10 = pnand %p1180_p5, %p1179_p2  ;;  %p1185_p12 = scmp.lt.s32.totalorder %s1183_s16, %s1178_s18 }
  0x46   : > { %p1182_p7 = pneg %p1181_p10  ;;  %p1186_p9 = por %p1185_p12, %p1184_p1 }
  0x48   : > { %p1187_p13 = pnand %p1186_p9, %p1182_p7 }
  0x4a   : > { %1190 = shalt.err (!%p1187_p13)
}
  0x4b   : > { %s1191_s21 = scalar_lea.vmem %s1447_s13, 256  ;;  %s1285_s19 = smov [#allocation2]  }
  0x4c   : > { %p1192_p0 = scmp.ne.s32.totalorder %s1447_s13, %s1191_s21  ;;  %s1196_s1 = sshll.u32 %s1285_s19, 4  ;;  %s1197_s1 = int_to_ptr.vmem [resolvable:$false] %s1196_s1 }
  0x4d   : > { %s1198_s22 = scalar_lea.vmem %s1197_s1, 512  ;;  %p1199_p10 = scmp.lt.s32.totalorder %s1447_s13, %s1197_s1 }
  0x4e   : > { %p1194_p6 = pnand %p1192_p0, %p1180_p5  ;;  %p1200_p3 = scmp.lt.s32.totalorder %s1198_s22, %s1191_s21 }
  0x50   : > { %p1195_p2 = pneg %p1194_p6  ;;  %p1201_p4 = por %p1200_p3, %p1199_p10 }
  0x52   : > { %p1202_p8 = pnand %p1201_p4, %p1195_p2 }
  0x54   : > { %1205 = shalt.err (!%p1202_p8)
}
  0x55   : > { %s1577_s18 = smov 4   ;;  %s1578_s23 = smov 64  }
  0x56   : > { %1022 = dma.hbm_to_vmem [thread:$0]  (!%p1443_p11), %s1441_s10, 256, %s1447_s13, %s1449_s15, %s1578_s23, %s1578_s23, %s1577_s18  }
  0x57   : > { %p1579_p6 = scmp.ne.s32.totalorder %s1572_s9, 0 }
  0x58   : > { %s1476_s19 = sand.u32 (!%p1579_p6), 1, %s1270_s25   ;;  %p1580_p4 = scmp.ne.s32.totalorder (!%p1579_p6), %s1570_s30, 0 }
  0x59   : > { %292 = sbr.rel (%p1579_p6) target bundleno = 762 (0x2fa), region = 48  ;;  %s862_s1 = sshll.u32 (!%p1579_p6), %s1476_s19, 4 }
  0x5a   : > { %s295_s16 = scalar_lea.sflag (!%p1579_p6), [#allocation3], %s1476_s19  ;;  %s1480_s29 = scalar_lea.vmem (!%p1579_p6), [#allocation2], %s862_s1 }
  0x5e   : > { %1249 = dma.done.wait (%p1580_p4), %s295_s16, 256  }
  0x5f   : > { %1251 = vsyncadd (%p1580_p4), %s295_s16, 4294967040  ;;  %p1581_p8 = scmp.eq.s32.totalorder %s1350_s28, 0 }
  0x61   : > { %1253 = dma.done.wait (%p1581_p8), [#allocation6], 2048   ;;  %p1582_p3 = pmov %p1581_p8 }
  0x63   : > { %1255 = vsyncadd (%p1582_p3), [#allocation6], 4294965248  ;;  %p1583_p11 = pmov %p1582_p3 }
  0x64   : > { %p1584_p5 = pmov %p1582_p3 }
  0x65   : > { %1257 = dma.done.wait (%p1583_p11), [#allocation9], 1024  }
  0x66   : > { %1259 = vsyncadd (%p1584_p5), [#allocation9], 4294966272  ;;  %v1074_v0 = vld [vmem:[#allocation5 + $0x38] sm:$0xff]   ;;  %v1075_v1 = vld [vmem:[#allocation5 + $0x30] sm:$0xff]   ;;  %s866_s12 = sshll.u32 %s1476_s19, 5  ;;  %s902_s18 = sshll.u32 %s1350_s28, 9 }
  0x67   : > { %933 = vmatprep.subr.bf16.mxu0 %v1074_v0  ;;  %v1076_v2 = vld [vmem:[#allocation5 + $0x28] sm:$0xff]   ;;  %v1077_v3 = vld [vmem:[#allocation5 + $0x20] sm:$0xff]   ;;  %v1084_v5 = vld [vmem:[#allocation7 + $0x38] sm:$0xff]   ;;  %s340_s21 = scalar_lea.vmem [#allocation10], %s866_s12  ;;  %s1512_s16 = scalar_lea.hbm %s1562_s7, %s902_s18 }
  0x68   : > { %934 = vmatpush3.bf16.msra.mxu0 %v1074_v0  ;;  %v1082_v4 = vld [vmem:[%s1480_s29] sm:$0xff]   ;;  %v1078_v7 = vld [vmem:[#allocation5 + $0x18] sm:$0xff]   ;;  %953 = vmatprep.subr.bf16.mxu1 %v1084_v5  ;;  %v1086_v9 = vld [vmem:[#allocation7 + $0x28] sm:$0xff]   ;;  %s750_s22 = sshll.u32 %s340_s21, 4  ;;  %p1585_p1 = scmp.ne.s32.totalorder %s1575_s20, 0  ;;  %s1507_s22 = int_to_ptr.vmem [resolvable:$true] %s750_s22 }
  0x69   : > { %935 = vmatprep.subr.bf16.mxu0 %v1075_v1  ;;  %949 = vmatprep.mubr.bf16.mxu0 %v1082_v4  ;;  %v1085_v6 = vld [vmem:[#allocation7 + $0x30] sm:$0xff]   ;;  %v1087_v10 = vld [vmem:[#allocation7 + $0x20] sm:$0xff]   ;;  %v1080_v11 = vld [vmem:[#allocation5 + $0x8] sm:$0xff]   ;;  %s1206_s30 = scalar_lea.vmem %s1507_s22, 512  ;;  %s1286_s28 = smov [#allocation10]  }
  0x6a   : > { %954 = vmatpush3.bf16.msra.mxu1 %v1084_v5  ;;  %v1079_v8 = vld [vmem:[#allocation5 + $0x10] sm:$0xff]   ;;  %v1088_v12 = vld [vmem:[#allocation7 + $0x18] sm:$0xff]   ;;  %v1081_v13 = vld [vmem:[#allocation5] sm:$0xff]   ;;  %p1207_p7 = scmp.ne.s32.totalorder %s1507_s22, %s1206_s30  ;;  %s1210_s9 = sshll.u32 %s1286_s28, 4  ;;  %s1211_s9 = int_to_ptr.vmem [resolvable:$false] %s1210_s9 }
  0x6b   : > { %955 = vmatprep.subr.bf16.mxu1 %v1085_v6  ;;  %v1083_v14 = vld [vmem:[%s1480_s29 + $0x8] sm:$0xff]   ;;  %v1089_v15 = vld [vmem:[#allocation7 + $0x10] sm:$0xff]   ;;  %v1091_v17 = vld [vmem:[#allocation7] sm:$0xff]   ;;  %s737_s29 = scalar_lea.sflag [#allocation4], %s1476_s19  ;;  %s1212_s10 = scalar_lea.vmem %s1211_s9, 1024 }
  0x6c   : > { %936 = vmatpush3.bf16.msra.mxu0 %v1075_v1  ;;  %v1090_v16 = vld [vmem:[#allocation7 + $0x8] sm:$0xff]   ;;  %v1092_v18 = vld [vmem:[#allocation8 + $0x38] sm:$0xff]   ;;  %v1093_v19 = vld [vmem:[#allocation8 + $0x30] sm:$0xff]   ;;  %p1208_p12 = pnand %p1207_p7, %p1585_p1  ;;  %p1213_p13 = scmp.lt.s32.totalorder %s1507_s22, %s1211_s9 }
  0x6d   : > { %937 = vmatprep.subr.bf16.mxu0 %v1076_v2  ;;  %v1094_v20 = vld [vmem:[#allocation8 + $0x28] sm:$0xff]   ;;  %v1095_v21 = vld [vmem:[#allocation8 + $0x20] sm:$0xff]   ;;  %v1096_v22 = vld [vmem:[#allocation8 + $0x18] sm:$0xff]   ;;  %p1214_p0 = scmp.lt.s32.totalorder %s1212_s10, %s1206_s30 }
  0x6e   : > { %956 = vmatpush3.bf16.msra.mxu1 %v1085_v6  ;;  %v867_v25 = vld [vmem:[%s1557_s2] ss:$0 sm:$0xff]  ;;  %v1097_v38 = vld [vmem:[#allocation8 + $0x10] sm:$0xff]   ;;  %v1098_v39 = vld [vmem:[#allocation8 + $0x8] sm:$0xff]   ;;  %p1209_p9 = pneg %p1208_p12 }
  0x6f   : > { %957 = vmatprep.subr.bf16.mxu1 %v1086_v9  ;;  %v1099_v40 = vld [vmem:[#allocation8] sm:$0xff]   ;;  %p1215_p2 = por %p1214_p0, %p1213_p13 }
  0x70   : > { %938 = vmatpush3.bf16.msra.mxu0 %v1076_v2  ;;  %v878_v43 = vld [vmem:[%s1559_s4] ss:$0 sm:$0xff] }
  0x71   : > { %939 = vmatprep.subr.bf16.mxu0 %v1077_v3  ;;  %v887_v56 = vld [vmem:[%s1561_s6] ss:$0 sm:$0xff]  ;;  %p1216_p10 = pnand %p1215_p2, %p1209_p9 }
  0x72   : > { %958 = vmatpush3.bf16.msra.mxu1 %v1086_v9 }
  0x73   : > { %959 = vmatprep.subr.bf16.mxu1 %v1087_v10 }
  0x74   : > { %940 = vmatpush3.bf16.msra.mxu0 %v1077_v3 }
  0x75   : > { %941 = vmatprep.subr.bf16.mxu0 %v1078_v7 }
  0x76   : > { %960 = vmatpush3.bf16.msra.mxu1 %v1087_v10 }
  0x77   : > { %961 = vmatprep.subr.bf16.mxu1 %v1088_v12 }
  0x78   : > { %942 = vmatpush3.bf16.msra.mxu0 %v1078_v7 }
  0x79   : > { %943 = vmatprep.subr.bf16.mxu0 %v1079_v8 }
  0x7a   : > { %962 = vmatpush3.bf16.msra.mxu1 %v1088_v12 }
  0x7b   : > { %963 = vmatprep.subr.bf16.mxu1 %v1089_v15 }
  0x7c   : > { %944 = vmatpush3.bf16.msra.mxu0 %v1079_v8 }
  0x7d   : > { %945 = vmatprep.subr.bf16.mxu0 %v1080_v11 }
  0x7e   : > { %964 = vmatpush3.bf16.msra.mxu1 %v1089_v15 }
  0x7f   : > { %965 = vmatprep.subr.bf16.mxu1 %v1090_v16 }
  0x80   : > { %946 = vmatpush3.bf16.msra.mxu0 %v1080_v11 }
  0x81   : > { %947 = vmatprep.subr.bf16.mxu0 %v1081_v13 }
  0x82   : > { %966 = vmatpush3.bf16.msra.mxu1 %v1090_v16 }
  0x83   : > { %967 = vmatprep.subr.bf16.mxu1 %v1091_v17 }
  0x84   : > { %948 = vmatpush3.bf16.msra.mxu0 %v1081_v13 }
  0x85   : > { %973 = vmatprep.subr.bf16.mxu0 %v1092_v18 }
  0x86   : > { %968 = vmatpush3.bf16.msra.mxu1 %v1091_v17 }
  0x87   : > { %950 = vmatmul.mubr.bf16.vlgmr.msra.gmra.mxu0 %v1083_v14 }
  0x88   : > { %974 = vmatpush3.bf16.msra.mxu0 %v1092_v18 }
  0x89   : > { %975 = vmatprep.subr.bf16.mxu0 %v1093_v19 }
  0x8c   : > { %976 = vmatpush3.bf16.msra.mxu0 %v1093_v19 }
  0x8d   : > { %977 = vmatprep.subr.bf16.mxu0 %v1094_v20 }
  0x90   : > { %978 = vmatpush3.bf16.msra.mxu0 %v1094_v20 }
  0x91   : > { %979 = vmatprep.subr.bf16.mxu0 %v1095_v21 }
  0x94   : > { %980 = vmatpush3.bf16.msra.mxu0 %v1095_v21 }
  0x95   : > { %981 = vmatprep.subr.bf16.mxu0 %v1096_v22 }
  0x98   : > { %982 = vmatpush3.bf16.msra.mxu0 %v1096_v22 }
  0x99   : > { %983 = vmatprep.subr.bf16.mxu0 %v1097_v38 }
  0x9c   : > { %984 = vmatpush3.bf16.msra.mxu0 %v1097_v38 }
  0x9d   : > { %985 = vmatprep.subr.bf16.mxu0 %v1098_v39 }
  0xa0   : > { %986 = vmatpush3.bf16.msra.mxu0 %v1098_v39 }
  0xa1   : > { %987 = vmatprep.subr.bf16.mxu0 %v1099_v40 }
  0xa4   : > { %988 = vmatpush3.bf16.msra.mxu0 %v1099_v40 }
 0x147   : > { %v951_v23 = vpop.f32.mrf.mxu0 }
 0x148   : > { %v474_v29 = vadd.f32 %v951_v23, %v867_v25 }
 0x149   : > { %v465_v24 = vpop.f32.mrf.mxu0 }
 0x14a   : > { %v466_v27 = vadd.f32 %v867_v25, %v465_v24  ;;  %v482_v35 = vmax.f32 %v474_v29, 0.0 }
 0x14b   : > { %v952_v26 = vpop.f32.mrf.mxu0 }
 0x14c   : > { %v477_v28 = vadd.f32 %v952_v26, %v867_v25  ;;  %v480_v33 = vmax.f32 %v466_v27, 0.0 }
 0x14d   : > { %v468_v30 = vpop.f32.mrf.mxu0 }
 0x14e   : > { %v469_v31 = vadd.f32 %v867_v25, %v468_v30  ;;  %v483_v32 = vmax.f32 %v477_v28, 0.0 }
 0x150   : > { %v481_v34 = vmax.f32 %v469_v31, 0.0  ;;  %v485_v37 = vpack.c.bf16 %v483_v32, %v482_v35 }
 0x152   : > { %v484_v36 = vpack.c.bf16 %v481_v34, %v480_v33 }
 0x154   : > { %969 = vmatprep.mubr.bf16.mxu1 %v484_v36 }
 0x155   : > { %970 = vmatmul.mubr.bf16.vlgmr.msra.gmra.mxu1 %v485_v37 }
 0x215   : > { %v971_v41 = vpop.f32.mrf.mxu1 }
 0x216   : > { %v600_v47 = vadd.f32 %v971_v41, %v878_v43 }
 0x217   : > { %v591_v42 = vpop.f32.mrf.mxu1 }
 0x218   : > { %v592_v45 = vadd.f32 %v878_v43, %v591_v42  ;;  %v608_v53 = vmax.f32 %v600_v47, 0.0 }
 0x219   : > { %v972_v44 = vpop.f32.mrf.mxu1 }
 0x21a   : > { %v603_v46 = vadd.f32 %v972_v44, %v878_v43  ;;  %v606_v51 = vmax.f32 %v592_v45, 0.0 }
 0x21b   : > { %v594_v48 = vpop.f32.mrf.mxu1 }
 0x21c   : > { %v595_v49 = vadd.f32 %v878_v43, %v594_v48  ;;  %v609_v50 = vmax.f32 %v603_v46, 0.0 }
 0x21e   : > { %v607_v52 = vmax.f32 %v595_v49, 0.0  ;;  %v611_v55 = vpack.c.bf16 %v609_v50, %v608_v53 }
 0x220   : > { %v610_v54 = vpack.c.bf16 %v607_v52, %v606_v51 }
 0x222   : > { %989 = vmatprep.mubr.bf16.mxu0 %v610_v54 }
 0x223   : > { %990 = vmatmul.mubr.bf16.vlgmr.msra.gmra.mxu0 %v611_v55 }
 0x2e3   : > { %v991_v57 = vpop.f32.mrf.mxu0 }
 0x2e4   : > { %v726_v58 = vadd.f32 %v991_v57, %v887_v56 }
 0x2e5   : > { %v717_v59 = vpop.f32.mrf.mxu0 }
 0x2e6   : > { %734 = vst [vmem:[%s340_s21 + $0x10] sm:$0xff] %v726_v58  ;;  %v718_v60 = vadd.f32 %v887_v56, %v717_v59 }
 0x2e7   : > { %v992_v61 = vpop.f32.mrf.mxu0 }
 0x2e8   : > { %732 = vst [vmem:[%s340_s21] sm:$0xff] %v718_v60  ;;  %v729_v62 = vadd.f32 %v992_v61, %v887_v56 }
 0x2e9   : > { %v720_v63 = vpop.f32.mrf.mxu0 }
 0x2ea   : > { %735 = vst [vmem:[%s340_s21 + $0x18] sm:$0xff] %v729_v62  ;;  %v721_v0 = vadd.f32 %v887_v56, %v720_v63 }
 0x2ec   : > { %733 = vst [vmem:[%s340_s21 + $0x8] sm:$0xff] %v721_v0 }
 0x2ed   : > { %1219 = shalt.err (!%p1216_p10)
}
 0x2ee   : > { %s1220_s13 = scalar_lea.hbm %s1512_s16, 512  ;;  %s1224_s11 = scalar_lea.hbm %s1562_s7, 1024 }
 0x2ef   : > { %p1221_p6 = scmp.ne.s32.totalorder %s1512_s16, %s1220_s13  ;;  %p1225_p3 = scmp.lt.s32.totalorder %s1512_s16, %s1562_s7 }
 0x2f0   : > { %p1226_p11 = scmp.lt.s32.totalorder %s1224_s11, %s1220_s13 }
 0x2f1   : > { %p1222_p4 = pnand %p1221_p6, %p1585_p1 }
 0x2f2   : > { %p1227_p5 = por %p1226_p11, %p1225_p3 }
 0x2f3   : > { %p1223_p8 = pneg %p1222_p4 }
 0x2f5   : > { %p1228_p7 = pnand %p1227_p5, %p1223_p8 }
 0x2f7   : > { %1231 = shalt.err (!%p1228_p7)
}
 0x2f8   : > { %s1287_s23 = smov 128   ;;  %s1288_s1 = smov 8  }
 0x2f9   : > { %1007 = dma.vmem_to_hbm [thread:$0]  (%p1585_p1), %s1507_s22, 512, %s1512_s16, %s737_s29, %s1287_s23, %s1287_s23, %s1288_s1  }
 0x2fa PF: > { %s765_s30 = sand.u32 1, %s1266_s24   ;;  %p1586_p12 = scmp.ne.s32.totalorder %s1571_s8, 0 }
 0x2fb   : > { %p1587_p9 = scmp.ge.s32.totalorder %s1278_s27, 2  ;;  %s766_s28 = scalar_lea.sflag [#allocation4], %s765_s30 }
 0x2fd   : > { %p1024_p13 = pnand %p1587_p9, %p1586_p12 }
 0x2ff   : > { %p1025_p0 = pneg %p1024_p13 }
 0x301   : > { %1261 = dma.done.wait (%p1025_p0), %s766_s28, 512  }
 0x302   : > { %1263 = vsyncadd (%p1025_p0), %s766_s28, 4294966784  ;;  %p22_p2 = scmp.ge.s32.totalorder %s1418_s14, 4   ;;  %s1588_s24 = smov %s1270_s25 }
 0x303   : > { %s1589_s25 = smov %s1274_s26  ;;  %s1590_s26 = smov %s1428_s17 }
 0x304   : > { %s1591_s27 = smov %s1418_s14  ;;  %24 = sbr.rel (!%p22_p2) target bundleno = 9 (0x9), region = 105 }
 0x309   :  { %771 = vsyncpa [#allocation3], 1 }
 0x30a   :  { %773 = vsyncpa [#allocation3 + $0x1], 1 }
 0x30b   :  { %774 = vsyncpa [#allocation6], 1 }
 0x30c   :  { %775 = vsyncpa [#allocation9], 1 }
 0x30d   :  { %776 = vsyncpa [#allocation4], 1 }
 0x30e   :  { %778 = vsyncpa [#allocation4 + $0x1], 1 }

// kernel: tpu_custom_call.1
= control target key start
LH: loop header
LB: loop body
LE: loop exit
PB: predicated region body
PF: predicated region fallthrough
CT: control target
= control target key end

     0   :  { %s1555_s0 = inlined_call_operand.hbm [shape: bf16[64,128], index: 0, kind: input, shape index: {}]   ;;  %s1556_s1 = inlined_call_operand.hbm [shape: bf16[128,128], index: 1, kind: input, shape index: {}]   ;;  %s1557_s2 = inlined_call_operand.vmem [shape: f32[1,128], index: 2, kind: input, shape index: {}]   ;;  %s1558_s3 = inlined_call_operand.hbm [shape: bf16[128,128], index: 3, kind: input, shape index: {}]   ;;  %s1559_s4 = inlined_call_operand.vmem [shape: f32[1,128], index: 4, kind: input, shape index: {}]   ;;  %s1560_s5 = inlined_call_operand.hbm [shape: bf16[128,128], index: 5, kind: input, shape index: {}]   ;;  %s1561_s6 = inlined_call_operand.vmem [shape: f32[1,128], index: 6, kind: input, shape index: {}]   ;;  %s1562_s7 = inlined_call_operand.hbm [shape: f32[64,128], index: 7, kind: output, shape index: {}]  }
   0x1   :  { %1569 = sst [smem:[#allocation15_spill]] %s1556_s1 }
   0x2   :  { %12 = vsyncpa [#allocation3], 0 }
   0x3   :  { %14 = vsyncpa [#allocation3 + $0x1], 0 }
   0x4   :  { %15 = vsyncpa [#allocation6], 0 }
   0x5   :  { %16 = vsyncpa [#allocation9], 0 }
   0x6   :  { %17 = vsyncpa [#allocation4], 0 }
   0x7   :  { %19 = vsyncpa [#allocation4 + $0x1], 0  ;;  %s1329_s24 = smov 0   ;;  %s1331_s25 = smov 0  }
   0x8   :  { %s1333_s26 = smov 0   ;;  %s1335_s27 = smov 0  }
   0x9 LB: > { %s1350_s28 = sadd.s32 4294967295, %s1278_s27   ;;  %s852_s29 = sadd.s32 4294967294, %s1278_s27   ;;  %s1278_s27 = sphi %s1335_s27, %s1591_s27   ;;  %s1274_s26 = sphi %s1333_s26, %s1590_s26   ;;  %s1270_s25 = sphi %s1331_s25, %s1589_s25   ;;  %s1266_s24 = sphi %s1329_s24, %s1588_s24  }
   0xa   : > { %p45_p0 = scmp.ne.s32.totalorder %s1270_s25, %s1266_s24  ;;  %p1563_p1 = scmp.eq.s32.totalorder %s1350_s28, 0 }
   0xb   : > { %p195_p2 = scmp.eq.s32.totalorder %s1350_s28, 1  ;;  %p201_p3 = scmp.eq.s32.totalorder %s852_s29, 1 }
   0xc   : > { %p1359_p4 = por %p1563_p1, %p45_p0  ;;  %p853_p5 = scmp.ge.s32.totalorder %s1278_s27, 1 }
   0xd   : > { %p1364_p6 = por %p201_p3, %p45_p0  ;;  %p208_p7 = scmp.lt.s32.totalorder %s1278_s27, 3 }
   0xe   : > { %s1570_s30 = scalar_select %p1359_p4, 1, 0 }
   0xf   : > { %s1571_s8 = scalar_select %p1364_p6, 1, 0 }
  0x10   : > { %p1369_p8 = pnand %p853_p5, %p208_p7  ;;  %s1280_s10 = smov [#allocation5]  }
  0x11   : > { %s220_s11 = sshll.u32 %s1280_s10, 4  ;;  %s1281_s13 = smov [#allocation7]   ;;  %s221_s11 = int_to_ptr.vmem [resolvable:$true] %s220_s11 }
  0x12   : > { %s1572_s9 = scalar_select %p1369_p8, 1, 0 }
  0x13   : > { %p1009_p9 = pneg %p1369_p8  ;;  %s236_s14 = sshll.u32 %s1281_s13, 4  ;;  %s237_s14 = int_to_ptr.vmem [resolvable:$true] %s236_s14 }
  0x14   : > { %s1282_s15 = smov [#allocation8]   ;;  %s1111_s17 = scalar_lea.vmem %s221_s11, 1024 }
  0x15   : > { %p1378_p11 = pnand %p1009_p9, %p1563_p1  ;;  %s252_s16 = sshll.u32 %s1282_s15, 4  ;;  %s253_s16 = int_to_ptr.vmem [resolvable:$true] %s252_s16 }
  0x16   : > { %p1112_p13 = scmp.ne.s32.totalorder %s221_s11, %s1111_s17  ;;  %p1119_p5 = scmp.lt.s32.totalorder %s221_s11, %s221_s11 }
  0x17   : > { %p1102_p12 = pneg %p1378_p11  ;;  %p1120_p7 = scmp.lt.s32.totalorder %s1111_s17, %s1111_s17 }
  0x19   : > { %p1114_p0 = pnand %p1112_p13, %p1102_p12  ;;  %p1121_p9 = por %p1120_p7, %p1119_p5 }
  0x1b   : > { %p1115_p3 = pneg %p1114_p0 }
  0x1d   : > { %p1122_p10 = pnand %p1121_p9, %p1115_p3 }
  0x1f   : > { %1125 = shalt.err (!%p1122_p10)
}
  0x20   : > { %s1564_s18 = smov 64   ;;  %s1565_s19 = smov 4  }
  0x21   : > { %s1574_s1 = sld [smem:[#allocation15_spill]]  ;;  %s1137_s22 = scalar_lea.vmem %s237_s14, 1024 }
  0x22   : > { %p1138_p13 = scmp.ne.s32.totalorder %s237_s14, %s1137_s22  ;;  %p1145_p3 = scmp.lt.s32.totalorder %s237_s14, %s237_s14 }
  0x23   : > { %p1146_p10 = scmp.lt.s32.totalorder %s1137_s22, %s1137_s22 }
  0x24   : > { %p1140_p0 = pnand %p1138_p13, %p1102_p12 }
  0x25   : > { %p1147_p7 = por %p1146_p10, %p1145_p3 }
  0x26   : > { %p1141_p5 = pneg %p1140_p0 }
  0x27   : > { %1012 = dma.hbm_to_vmem [thread:$0]  (!%p1378_p11), %s1574_s1, 1024, %s221_s11, [#allocation6], %s1564_s18, %s1564_s18, %s1565_s19  }
  0x28   : > { %p1148_p9 = pnand %p1147_p7, %p1141_p5 }
  0x2a   : > { %1151 = shalt.err (!%p1148_p9)
}
  0x2b   : > { %1015 = dma.hbm_to_vmem [thread:$0]  (!%p1378_p11), %s1558_s3, 1024, %s237_s14, [#allocation6], %s1564_s18, %s1564_s18, %s1565_s19  }
  0x2c   : > { %s1163_s10 = scalar_lea.vmem %s253_s16, 1024  ;;  %p1171_p3 = scmp.lt.s32.totalorder %s253_s16, %s253_s16 }
  0x2d   : > { %p1164_p1 = scmp.ne.s32.totalorder %s253_s16, %s1163_s10  ;;  %p1172_p5 = scmp.lt.s32.totalorder %s1163_s10, %s1163_s10 }
  0x2f   : > { %p1166_p13 = pnand %p1164_p1, %p1102_p12  ;;  %p1173_p10 = por %p1172_p5, %p1171_p3 }
  0x31   : > { %p1167_p0 = pneg %p1166_p13 }
  0x33   : > { %p1174_p7 = pnand %p1173_p10, %p1167_p0 }
  0x35   : > { %1177 = shalt.err (!%p1174_p7)
}
  0x36   : > { %1018 = dma.hbm_to_vmem [thread:$0]  (!%p1378_p11), %s1560_s5, 1024, %s253_s16, [#allocation9], %s1564_s18, %s1564_s18, %s1565_s19  }
  0x37   : > { %s1418_s14 = sadd.s32 1, %s1278_s27   ;;  %s32_s15 = sadd.s32 1, %s1274_s26 }
  0x38   : > { %s29_s12 = ssub.s32 %s1278_s27, %s1418_s14  ;;  %p39_p12 = scmp.ne.s32.totalorder %s1274_s26, %s1270_s25 }
  0x39   : > { %p30_p1 = scmp.eq.s32.totalorder %s29_s12, 0  ;;  %p40_p9 = scmp.eq.s32.totalorder %s1278_s27, 0 }
  0x3a   : > { %p1030_p13 = scmp.lt.s32.totalorder %s1278_s27, 2  ;;  %p1432_p3 = por %p195_p2, %p39_p12 }
  0x3b   : > { %s1428_s17 = scalar_select %p30_p1, %s1274_s26, %s32_s15  }
  0x3c   : > { %p41_p0 = por %p40_p9, %p39_p12  ;;  %s269_s21 = sand.u32 1, %s1274_s26  }
  0x3d   : > { %s1575_s20 = scalar_select %p1432_p3, 1, 0 }
  0x3e   : > { %s901_s22 = sshll.u32 %s1278_s27, 8  ;;  %s858_s16 = sshll.u32 %s269_s21, 4 }
  0x3f   : > { %s1441_s10 = scalar_lea.hbm %s1555_s0, %s901_s22  ;;  %s273_s11 = scalar_lea.vmem [#allocation2], %s858_s16 }
  0x40   : > { %s280_s13 = sshll.u32 %s273_s11, 4  ;;  %p1443_p11 = pnand %p1030_p13, %p41_p0  ;;  %s1447_s13 = int_to_ptr.vmem [resolvable:$true] %s280_s13 }
  0x41   : > { %s1449_s15 = scalar_lea.sflag [#allocation3], %s269_s21  ;;  %s1178_s18 = scalar_lea.hbm %s1441_s10, 256 }
  0x42   : > { %p1179_p2 = scmp.ne.s32.totalorder %s1441_s10, %s1178_s18  ;;  %p1180_p5 = pneg %p1443_p11 }
  0x43   : > { %s1183_s16 = scalar_lea.hbm %s1555_s0, 512  ;;  %p1184_p1 = scmp.lt.s32.totalorder %s1441_s10, %s1555_s0 }
  0x44   : > { %p1181_p10 = pnand %p1180_p5, %p1179_p2  ;;  %p1185_p12 = scmp.lt.s32.totalorder %s1183_s16, %s1178_s18 }
  0x46   : > { %p1182_p7 = pneg %p1181_p10  ;;  %p1186_p9 = por %p1185_p12, %p1184_p1 }
  0x48   : > { %p1187_p13 = pnand %p1186_p9, %p1182_p7 }
  0x4a   : > { %1190 = shalt.err (!%p1187_p13)
}
  0x4b   : > { %s1191_s21 = scalar_lea.vmem %s1447_s13, 256  ;;  %s1285_s19 = smov [#allocation2]  }
  0x4c   : > { %p1192_p0 = scmp.ne.s32.totalorder %s1447_s13, %s1191_s21  ;;  %s1196_s1 = sshll.u32 %s1285_s19, 4  ;;  %s1197_s1 = int_to_ptr.vmem [resolvable:$false] %s1196_s1 }
  0x4d   : > { %s1198_s22 = scalar_lea.vmem %s1197_s1, 512  ;;  %p1199_p10 = scmp.lt.s32.totalorder %s1447_s13, %s1197_s1 }
  0x4e   : > { %p1194_p6 = pnand %p1192_p0, %p1180_p5  ;;  %p1200_p3 = scmp.lt.s32.totalorder %s1198_s22, %s1191_s21 }
  0x50   : > { %p1195_p2 = pneg %p1194_p6  ;;  %p1201_p4 = por %p1200_p3, %p1199_p10 }
  0x52   : > { %p1202_p8 = pnand %p1201_p4, %p1195_p2 }
  0x54   : > { %1205 = shalt.err (!%p1202_p8)
}
  0x55   : > { %s1577_s18 = smov 4   ;;  %s1578_s23 = smov 64  }
  0x56   : > { %1022 = dma.hbm_to_vmem [thread:$0]  (!%p1443_p11), %s1441_s10, 256, %s1447_s13, %s1449_s15, %s1578_s23, %s1578_s23, %s1577_s18  }
  0x57   : > { %p1579_p6 = scmp.ne.s32.totalorder %s1572_s9, 0 }
  0x58   : > { %s1476_s19 = sand.u32 (!%p1579_p6), 1, %s1270_s25   ;;  %p1580_p4 = scmp.ne.s32.totalorder (!%p1579_p6), %s1570_s30, 0 }
  0x59   : > { %292 = sbr.rel (%p1579_p6) target bundleno = 762 (0x2fa), region = 48  ;;  %s862_s1 = sshll.u32 (!%p1579_p6), %s1476_s19, 4 }
  0x5a   : > { %s295_s16 = scalar_lea.sflag (!%p1579_p6), [#allocation3], %s1476_s19  ;;  %s1480_s29 = scalar_lea.vmem (!%p1579_p6), [#allocation2], %s862_s1 }
  0x5e   : > { %1249 = dma.done.wait (%p1580_p4), %s295_s16, 256  }
  0x5f   : > { %1251 = vsyncadd (%p1580_p4), %s295_s16, 4294967040  ;;  %p1581_p8 = scmp.eq.s32.totalorder %s1350_s28, 0 }
  0x61   : > { %1253 = dma.done.wait (%p1581_p8), [#allocation6], 2048   ;;  %p1582_p3 = pmov %p1581_p8 }
  0x63   : > { %1255 = vsyncadd (%p1582_p3), [#allocation6], 4294965248  ;;  %p1583_p11 = pmov %p1582_p3 }
  0x64   : > { %p1584_p5 = pmov %p1582_p3 }
  0x65   : > { %1257 = dma.done.wait (%p1583_p11), [#allocation9], 1024  }
  0x66   : > { %1259 = vsyncadd (%p1584_p5), [#allocation9], 4294966272  ;;  %v1074_v0 = vld [vmem:[#allocation5 + $0x38] sm:$0xff]   ;;  %v1075_v1 = vld [vmem:[#allocation5 + $0x30] sm:$0xff]   ;;  %s866_s12 = sshll.u32 %s1476_s19, 5  ;;  %s902_s18 = sshll.u32 %s1350_s28, 9 }
  0x67   : > { %933 = vmatprep.subr.bf16.mxu0 %v1074_v0  ;;  %v1076_v2 = vld [vmem:[#allocation5 + $0x28] sm:$0xff]   ;;  %v1077_v3 = vld [vmem:[#allocation5 + $0x20] sm:$0xff]   ;;  %v1084_v5 = vld [vmem:[#allocation7 + $0x38] sm:$0xff]   ;;  %s340_s21 = scalar_lea.vmem [#allocation10], %s866_s12  ;;  %s1512_s16 = scalar_lea.hbm %s1562_s7, %s902_s18 }
  0x68   : > { %934 = vmatpush3.bf16.msra.mxu0 %v1074_v0  ;;  %v1082_v4 = vld [vmem:[%s1480_s29] sm:$0xff]   ;;  %v1078_v7 = vld [vmem:[#allocation5 + $0x18] sm:$0xff]   ;;  %953 = vmatprep.subr.bf16.mxu1 %v1084_v5  ;;  %v1086_v9 = vld [vmem:[#allocation7 + $0x28] sm:$0xff]   ;;  %s750_s22 = sshll.u32 %s340_s21, 4  ;;  %p1585_p1 = scmp.ne.s32.totalorder %s1575_s20, 0  ;;  %s1507_s22 = int_to_ptr.vmem [resolvable:$true] %s750_s22 }
  0x69   : > { %935 = vmatprep.subr.bf16.mxu0 %v1075_v1  ;;  %949 = vmatprep.mubr.bf16.mxu0 %v1082_v4  ;;  %v1085_v6 = vld [vmem:[#allocation7 + $0x30] sm:$0xff]   ;;  %v1087_v10 = vld [vmem:[#allocation7 + $0x20] sm:$0xff]   ;;  %v1080_v11 = vld [vmem:[#allocation5 + $0x8] sm:$0xff]   ;;  %s1206_s30 = scalar_lea.vmem %s1507_s22, 512  ;;  %s1286_s28 = smov [#allocation10]  }
  0x6a   : > { %954 = vmatpush3.bf16.msra.mxu1 %v1084_v5  ;;  %v1079_v8 = vld [vmem:[#allocation5 + $0x10] sm:$0xff]   ;;  %v1088_v12 = vld [vmem:[#allocation7 + $0x18] sm:$0xff]   ;;  %v1081_v13 = vld [vmem:[#allocation5] sm:$0xff]   ;;  %p1207_p7 = scmp.ne.s32.totalorder %s1507_s22, %s1206_s30  ;;  %s1210_s9 = sshll.u32 %s1286_s28, 4  ;;  %s1211_s9 = int_to_ptr.vmem [resolvable:$false] %s1210_s9 }
  0x6b   : > { %955 = vmatprep.subr.bf16.mxu1 %v1085_v6  ;;  %v1083_v14 = vld [vmem:[%s1480_s29 + $0x8] sm:$0xff]   ;;  %v1089_v15 = vld [vmem:[#allocation7 + $0x10] sm:$0xff]   ;;  %v1091_v17 = vld [vmem:[#allocation7] sm:$0xff]   ;;  %s737_s29 = scalar_lea.sflag [#allocation4], %s1476_s19  ;;  %s1212_s10 = scalar_lea.vmem %s1211_s9, 1024 }
  0x6c   : > { %936 = vmatpush3.bf16.msra.mxu0 %v1075_v1  ;;  %v1090_v16 = vld [vmem:[#allocation7 + $0x8] sm:$0xff]   ;;  %v1092_v18 = vld [vmem:[#allocation8 + $0x38] sm:$0xff]   ;;  %v1093_v19 = vld [vmem:[#allocation8 + $0x30] sm:$0xff]   ;;  %p1208_p12 = pnand %p1207_p7, %p1585_p1  ;;  %p1213_p13 = scmp.lt.s32.totalorder %s1507_s22, %s1211_s9 }
  0x6d   : > { %937 = vmatprep.subr.bf16.mxu0 %v1076_v2  ;;  %v1094_v20 = vld [vmem:[#allocation8 + $0x28] sm:$0xff]   ;;  %v1095_v21 = vld [vmem:[#allocation8 + $0x20] sm:$0xff]   ;;  %v1096_v22 = vld [vmem:[#allocation8 + $0x18] sm:$0xff]   ;;  %p1214_p0 = scmp.lt.s32.totalorder %s1212_s10, %s1206_s30 }
  0x6e   : > { %956 = vmatpush3.bf16.msra.mxu1 %v1085_v6  ;;  %v867_v25 = vld [vmem:[%s1557_s2] ss:$0 sm:$0xff]  ;;  %v1097_v38 = vld [vmem:[#allocation8 + $0x10] sm:$0xff]   ;;  %v1098_v39 = vld [vmem:[#allocation8 + $0x8] sm:$0xff]   ;;  %p1209_p9 = pneg %p1208_p12 }
  0x6f   : > { %957 = vmatprep.subr.bf16.mxu1 %v1086_v9  ;;  %v1099_v40 = vld [vmem:[#allocation8] sm:$0xff]   ;;  %p1215_p2 = por %p1214_p0, %p1213_p13 }
  0x70   : > { %938 = vmatpush3.bf16.msra.mxu0 %v1076_v2  ;;  %v878_v43 = vld [vmem:[%s1559_s4] ss:$0 sm:$0xff] }
  0x71   : > { %939 = vmatprep.subr.bf16.mxu0 %v1077_v3  ;;  %v887_v56 = vld [vmem:[%s1561_s6] ss:$0 sm:$0xff]  ;;  %p1216_p10 = pnand %p1215_p2, %p1209_p9 }
  0x72   : > { %958 = vmatpush3.bf16.msra.mxu1 %v1086_v9 }
  0x73   : > { %959 = vmatprep.subr.bf16.mxu1 %v1087_v10 }
  0x74   : > { %940 = vmatpush3.bf16.msra.mxu0 %v1077_v3 }
  0x75   : > { %941 = vmatprep.subr.bf16.mxu0 %v1078_v7 }
  0x76   : > { %960 = vmatpush3.bf16.msra.mxu1 %v1087_v10 }
  0x77   : > { %961 = vmatprep.subr.bf16.mxu1 %v1088_v12 }
  0x78   : > { %942 = vmatpush3.bf16.msra.mxu0 %v1078_v7 }
  0x79   : > { %943 = vmatprep.subr.bf16.mxu0 %v1079_v8 }
  0x7a   : > { %962 = vmatpush3.bf16.msra.mxu1 %v1088_v12 }
  0x7b   : > { %963 = vmatprep.subr.bf16.mxu1 %v1089_v15 }
  0x7c   : > { %944 = vmatpush3.bf16.msra.mxu0 %v1079_v8 }
  0x7d   : > { %945 = vmatprep.subr.bf16.mxu0 %v1080_v11 }
  0x7e   : > { %964 = vmatpush3.bf16.msra.mxu1 %v1089_v15 }
  0x7f   : > { %965 = vmatprep.subr.bf16.mxu1 %v1090_v16 }
  0x80   : > { %946 = vmatpush3.bf16.msra.mxu0 %v1080_v11 }
  0x81   : > { %947 = vmatprep.subr.bf16.mxu0 %v1081_v13 }
  0x82   : > { %966 = vmatpush3.bf16.msra.mxu1 %v1090_v16 }
  0x83   : > { %967 = vmatprep.subr.bf16.mxu1 %v1091_v17 }
  0x84   : > { %948 = vmatpush3.bf16.msra.mxu0 %v1081_v13 }
  0x85   : > { %973 = vmatprep.subr.bf16.mxu0 %v1092_v18 }
  0x86   : > { %968 = vmatpush3.bf16.msra.mxu1 %v1091_v17 }
  0x87   : > { %950 = vmatmul.mubr.bf16.vlgmr.msra.gmra.mxu0 %v1083_v14 }
  0x88   : > { %974 = vmatpush3.bf16.msra.mxu0 %v1092_v18 }
  0x89   : > { %975 = vmatprep.subr.bf16.mxu0 %v1093_v19 }
  0x8c   : > { %976 = vmatpush3.bf16.msra.mxu0 %v1093_v19 }
  0x8d   : > { %977 = vmatprep.subr.bf16.mxu0 %v1094_v20 }
  0x90   : > { %978 = vmatpush3.bf16.msra.mxu0 %v1094_v20 }
  0x91   : > { %979 = vmatprep.subr.bf16.mxu0 %v1095_v21 }
  0x94   : > { %980 = vmatpush3.bf16.msra.mxu0 %v1095_v21 }
  0x95   : > { %981 = vmatprep.subr.bf16.mxu0 %v1096_v22 }
  0x98   : > { %982 = vmatpush3.bf16.msra.mxu0 %v1096_v22 }
  0x99   : > { %983 = vmatprep.subr.bf16.mxu0 %v1097_v38 }
  0x9c   : > { %984 = vmatpush3.bf16.msra.mxu0 %v1097_v38 }
  0x9d   : > { %985 = vmatprep.subr.bf16.mxu0 %v1098_v39 }
  0xa0   : > { %986 = vmatpush3.bf16.msra.mxu0 %v1098_v39 }
  0xa1   : > { %987 = vmatprep.subr.bf16.mxu0 %v1099_v40 }
  0xa4   : > { %988 = vmatpush3.bf16.msra.mxu0 %v1099_v40 }
 0x147   : > { %v951_v23 = vpop.f32.mrf.mxu0 }
 0x148   : > { %v474_v29 = vadd.f32 %v951_v23, %v867_v25 }
 0x149   : > { %v465_v24 = vpop.f32.mrf.mxu0 }
 0x14a   : > { %v466_v27 = vadd.f32 %v867_v25, %v465_v24  ;;  %v482_v35 = vmax.f32 %v474_v29, 0.0 }
 0x14b   : > { %v952_v26 = vpop.f32.mrf.mxu0 }
 0x14c   : > { %v477_v28 = vadd.f32 %v952_v26, %v867_v25  ;;  %v480_v33 = vmax.f32 %v466_v27, 0.0 }
 0x14d   : > { %v468_v30 = vpop.f32.mrf.mxu0 }
 0x14e   : > { %v469_v31 = vadd.f32 %v867_v25, %v468_v30  ;;  %v483_v32 = vmax.f32 %v477_v28, 0.0 }
 0x150   : > { %v481_v34 = vmax.f32 %v469_v31, 0.0  ;;  %v485_v37 = vpack.c.bf16 %v483_v32, %v482_v35 }
 0x152   : > { %v484_v36 = vpack.c.bf16 %v481_v34, %v480_v33 }
 0x154   : > { %969 = vmatprep.mubr.bf16.mxu1 %v484_v36 }
 0x155   : > { %970 = vmatmul.mubr.bf16.vlgmr.msra.gmra.mxu1 %v485_v37 }
 0x215   : > { %v971_v41 = vpop.f32.mrf.mxu1 }
 0x216   : > { %v600_v47 = vadd.f32 %v971_v41, %v878_v43 }
 0x217   : > { %v591_v42 = vpop.f32.mrf.mxu1 }
 0x218   : > { %v592_v45 = vadd.f32 %v878_v43, %v591_v42  ;;  %v608_v53 = vmax.f32 %v600_v47, 0.0 }
 0x219   : > { %v972_v44 = vpop.f32.mrf.mxu1 }
 0x21a   : > { %v603_v46 = vadd.f32 %v972_v44, %v878_v43  ;;  %v606_v51 = vmax.f32 %v592_v45, 0.0 }
 0x21b   : > { %v594_v48 = vpop.f32.mrf.mxu1 }
 0x21c   : > { %v595_v49 = vadd.f32 %v878_v43, %v594_v48  ;;  %v609_v50 = vmax.f32 %v603_v46, 0.0 }
 0x21e   : > { %v607_v52 = vmax.f32 %v595_v49, 0.0  ;;  %v611_v55 = vpack.c.bf16 %v609_v50, %v608_v53 }
 0x220   : > { %v610_v54 = vpack.c.bf16 %v607_v52, %v606_v51 }
 0x222   : > { %989 = vmatprep.mubr.bf16.mxu0 %v610_v54 }
 0x223   : > { %990 = vmatmul.mubr.bf16.vlgmr.msra.gmra.mxu0 %v611_v55 }
 0x2e3   : > { %v991_v57 = vpop.f32.mrf.mxu0 }
 0x2e4   : > { %v726_v58 = vadd.f32 %v991_v57, %v887_v56 }
 0x2e5   : > { %v717_v59 = vpop.f32.mrf.mxu0 }
 0x2e6   : > { %734 = vst [vmem:[%s340_s21 + $0x10] sm:$0xff] %v726_v58  ;;  %v718_v60 = vadd.f32 %v887_v56, %v717_v59 }
 0x2e7   : > { %v992_v61 = vpop.f32.mrf.mxu0 }
 0x2e8   : > { %732 = vst [vmem:[%s340_s21] sm:$0xff] %v718_v60  ;;  %v729_v62 = vadd.f32 %v992_v61, %v887_v56 }
 0x2e9   : > { %v720_v63 = vpop.f32.mrf.mxu0 }
 0x2ea   : > { %735 = vst [vmem:[%s340_s21 + $0x18] sm:$0xff] %v729_v62  ;;  %v721_v0 = vadd.f32 %v887_v56, %v720_v63 }
 0x2ec   : > { %733 = vst [vmem:[%s340_s21 + $0x8] sm:$0xff] %v721_v0 }
 0x2ed   : > { %1219 = shalt.err (!%p1216_p10)
}
 0x2ee   : > { %s1220_s13 = scalar_lea.hbm %s1512_s16, 512  ;;  %s1224_s11 = scalar_lea.hbm %s1562_s7, 1024 }
 0x2ef   : > { %p1221_p6 = scmp.ne.s32.totalorder %s1512_s16, %s1220_s13  ;;  %p1225_p3 = scmp.lt.s32.totalorder %s1512_s16, %s1562_s7 }
 0x2f0   : > { %p1226_p11 = scmp.lt.s32.totalorder %s1224_s11, %s1220_s13 }
 0x2f1   : > { %p1222_p4 = pnand %p1221_p6, %p1585_p1 }
 0x2f2   : > { %p1227_p5 = por %p1226_p11, %p1225_p3 }
 0x2f3   : > { %p1223_p8 = pneg %p1222_p4 }
 0x2f5   : > { %p1228_p7 = pnand %p1227_p5, %p1223_p8 }
 0x2f7   : > { %1231 = shalt.err (!%p1228_p7)
}
 0x2f8   : > { %s1287_s23 = smov 128   ;;  %s1288_s1 = smov 8  }
 0x2f9   : > { %1007 = dma.vmem_to_hbm [thread:$0]  (%p1585_p1), %s1507_s22, 512, %s1512_s16, %s737_s29, %s1287_s23, %s1287_s23, %s1288_s1  }
 0x2fa PF: > { %s765_s30 = sand.u32 1, %s1266_s24   ;;  %p1586_p12 = scmp.ne.s32.totalorder %s1571_s8, 0 }
 0x2fb   : > { %p1587_p9 = scmp.ge.s32.totalorder %s1278_s27, 2  ;;  %s766_s28 = scalar_lea.sflag [#allocation4], %s765_s30 }
 0x2fd   : > { %p1024_p13 = pnand %p1587_p9, %p1586_p12 }
 0x2ff   : > { %p1025_p0 = pneg %p1024_p13 }
 0x301   : > { %1261 = dma.done.wait (%p1025_p0), %s766_s28, 512  }
 0x302   : > { %1263 = vsyncadd (%p1025_p0), %s766_s28, 4294966784  ;;  %p22_p2 = scmp.ge.s32.totalorder %s1418_s14, 4   ;;  %s1588_s24 = smov %s1270_s25 }
 0x303   : > { %s1589_s25 = smov %s1274_s26  ;;  %s1590_s26 = smov %s1428_s17 }
 0x304   : > { %s1591_s27 = smov %s1418_s14  ;;  %24 = sbr.rel (!%p22_p2) target bundleno = 9 (0x9), region = 105 }
 0x309   :  { %771 = vsyncpa [#allocation3], 1 }
 0x30a   :  { %773 = vsyncpa [#allocation3 + $0x1], 1 }
 0x30b   :  { %774 = vsyncpa [#allocation6], 1 }
 0x30c   :  { %775 = vsyncpa [#allocation9], 1 }
 0x30d   :  { %776 = vsyncpa [#allocation4], 1 }
 0x30e   :  { %778 = vsyncpa [#allocation4 + $0x1], 1 }

</bundles_post_ra>
